<compile_context>
chip_gen: v6e
topology: v6e:2x2x1
jax: 0.10.0
libtpu: 0.0.40
codegen_flags: <defaults>
</compile_context>

<pallas_src>
import functools
import math

import jax
import jax.numpy as jnp
from jax.experimental import pallas as pl
from jax.experimental.pallas import tpu as pltpu

_MIB = 1024 * 1024


def _round_up(x, m):
    return (x + m - 1) // m * m


def _pad2d(a, rows, cols):
    pr, pc = rows - a.shape[0], cols - a.shape[1]
    if pr == 0 and pc == 0:
        return a  # avoid an identity jnp.pad (extra HBM round-trip)
    return jnp.pad(a, ((0, pr), (0, pc)))


def _tpu_hw():
    """Best-effort (device_kind, vmem_capacity_bytes) query with safe fallbacks."""
    kind = ""
    try:
        kind = jax.devices()[0].device_kind.lower()
    except Exception:
        pass
    vmem = None
    try:
        info = pltpu.get_tpu_info()
        vmem = int(getattr(info, "vmem_capacity_bytes", 0)) or None
    except Exception:
        vmem = None
    if not vmem:
        vmem = 64 * _MIB if "v7" in kind else 128 * _MIB
    return kind, vmem


def _vmem_tile_bytes(tm, tn, Kp, Dp, in_bytes, out_bytes):
    return (2 * tm * Kp * in_bytes        # x row tile, double-buffered
            + Kp * Dp * in_bytes          # W1, single-buffered (constant block)
            + 2 * Dp * tn * in_bytes      # W2 column tile, double-buffered
            + 2 * tm * tn * out_bytes     # output tile, double-buffered
            + tm * Dp * in_bytes          # cached GELU hidden scratch
            + 4 * (Dp + tn) * in_bytes)   # biases (generous)


def _choose_tiles(kind, vmem_cap, M, Kp, Dp, tn_req, row_align, in_bytes, out_bytes, tm_req):
    # Generation-aware scoped VMEM limit: leave headroom, never claim the full chip.
    vmem_limit = int(max(32 * _MIB, min(vmem_cap - 16 * _MIB, 112 * _MIB)))

    if tm_req is not None:
        tm_target = int(tm_req)
    elif "v6" in kind:
        tm_target = 768           # ridge ~660 flop/B (918 TF/s vs ~1.4 TB/s)
    elif "v7" in kind:
        tm_target = 512           # per-core; only 64 MiB VMEM
    elif "v5" in kind:
        tm_target = 512           # ridge ~240 flop/B
    else:
        tm_target = 512 if vmem_cap <= 64 * _MIB else 768

    tn = max(128, min(tn_req, Dp))
    tm_cap = _round_up(M, row_align)
    tm = max(row_align, min(_round_up(tm_target, row_align), tm_cap))

    budget = int(0.9 * vmem_limit)
    while tm > row_align and _vmem_tile_bytes(tm, tn, Kp, Dp, in_bytes, out_bytes) > budget:
        tm = max(row_align, _round_up(tm // 2, row_align))
    # Shrink tn last (keep >= 256 when possible for full 2x256^2 MXU occupancy).
    while tn > 128 and _vmem_tile_bytes(tm, tn, Kp, Dp, in_bytes, out_bytes) > budget:
        tn = max(128, (tn // 2 // 128) * 128)
    return tm, tn, vmem_limit


def _mlp_projector_kernel(x_ref, w1_ref, b1_ref, w2_ref, b2_ref, o_ref, h_ref,
                          *, approximate_gelu):
    # Grid: i = token tile ("parallel"), j = W2 output-column tile ("arbitrary").
    #   x_ref:  (tm, Kp)    token tile (same block for every j -> stays resident)
    #   w1_ref: (Kp, Dp)    full first-layer weight (single-buffered)
    #   b1_ref: (1, Dp)
    #   w2_ref: (Dp, tn)    j-th column tile of the second-layer weight
    #   b2_ref: (1, tn)
    #   o_ref:  (tm, tn)
    #   h_ref:  (tm, Dp)    VMEM scratch caching GELU(x @ W1 + b1) for this row tile

    @pl.when(pl.program_id(1) == 0)
    def _compute_hidden():
        h = jnp.dot(x_ref[...], w1_ref[...], preferred_element_type=jnp.float32)
        h = h + b1_ref[...].astype(jnp.float32)
        if approximate_gelu:
            # tanh GELU -> EUP slot (co-issues essentially free alongside MXU work).
            c = math.sqrt(2.0 / math.pi)
            h = 0.5 * h * (1.0 + jnp.tanh(c * (h + 0.044715 * h * h * h)))
        else:
            # Exact erf GELU, matching torch.nn.GELU() default (approximate='none').
            h = 0.5 * h * (1.0 + jax.lax.erf(h * (1.0 / math.sqrt(2.0))))
        h_ref[...] = h.astype(h_ref.dtype)

    out = jnp.dot(h_ref[...], w2_ref[...], preferred_element_type=jnp.float32)
    out = out + b2_ref[...].astype(jnp.float32)
    o_ref[...] = out.astype(o_ref.dtype)


def mlp_projector(img_patches, w1, b1, w2, b2, *, tm=None, tn=512,
                  approximate_gelu=False, compute_dtype=None):
    """img_patches: (B, N, vision_dim) -> (B, N, llm_dim)."""
    B, N, vision_dim = img_patches.shape
    assert w1.shape[0] == vision_dim
    llm_dim = w1.shape[1]
    assert w2.shape == (llm_dim, llm_dim)
    assert b1.shape == (llm_dim,) and b2.shape == (llm_dim,)
    assert tn % 128 == 0

    out_dtype = img_patches.dtype
    cdtype = jnp.dtype(compute_dtype) if compute_dtype is not None else jnp.dtype(out_dtype)
    in_bytes = cdtype.itemsize
    out_bytes = jnp.dtype(out_dtype).itemsize
    M = B * N

    # Sublane alignment of the row tile: 8 for 32-bit, 16 for bf16, 32 for 8-bit.
    row_align = 8 * max(1, 4 // in_bytes)

    Kp = _round_up(vision_dim, 128)          # padded vision_dim (lane dim of x)
    Dp0 = _round_up(llm_dim, 128)

    kind, vmem_cap = _tpu_hw()
    tm_eff, tn_eff, vmem_limit = _choose_tiles(
        kind, vmem_cap, M, Kp, Dp0, min(tn, Dp0), row_align, in_bytes, out_bytes, tm)

    Dp = _round_up(Dp0, tn_eff)              # padded llm_dim (multiple of tn_eff)
    Mp = _round_up(M, tm_eff)

    # Zero-padding is exact: padded rows/cols contribute 0.0 and are sliced away.
    x2d = _pad2d(img_patches.reshape(M, vision_dim).astype(cdtype), Mp, Kp)
    w1p = _pad2d(w1.astype(cdtype), Kp, Dp)
    b1p = _pad2d(b1.reshape(1, llm_dim).astype(cdtype), 1, Dp)
    w2p = _pad2d(w2.astype(cdtype), Dp, Dp)
    b2p = _pad2d(b2.reshape(1, llm_dim).astype(cdtype), 1, Dp)

    grid = (Mp // tm_eff, Dp // tn_eff)
    gi = grid[0]

    # Real traffic: x & W2/b2 are re-streamed once per row tile; W1/b1 fetched once.
    cost = pl.CostEstimate(
        flops=2 * Mp * Kp * Dp + 2 * Mp * Dp * Dp,
        transcendentals=Mp * Dp,
        bytes_accessed=(Mp * Kp * in_bytes
                        + Kp * Dp * in_bytes
                        + Dp * in_bytes
                        + gi * Dp * Dp * in_bytes
                        + gi * Dp * in_bytes
                        + Mp * Dp * out_bytes),
    )

    kernel = functools.partial(_mlp_projector_kernel,
                               approximate_gelu=approximate_gelu)

    # Constant-index blocks don't need double buffers.
    single_buf = {"pipeline_mode": pl.Buffered(1)} if hasattr(pl, "Buffered") else {}

    out2d = pl.pallas_call(
        kernel,
        out_shape=jax.ShapeDtypeStruct((Mp, Dp), out_dtype),
        grid_spec=pltpu.PrefetchScalarGridSpec(
            num_scalar_prefetch=0,
            grid=grid,
            in_specs=[
                pl.BlockSpec((tm_eff, Kp), lambda i, j: (i, 0)),               # x row tile
                pl.BlockSpec((Kp, Dp), lambda i, j: (0, 0), **single_buf),     # W1 (resident)
                pl.BlockSpec((1, Dp), lambda i, j: (0, 0), **single_buf),      # b1
                pl.BlockSpec((Dp, tn_eff), lambda i, j: (0, j)),               # W2 column tile
                pl.BlockSpec((1, tn_eff), lambda i, j: (0, j)),                # b2 column tile
            ],
            out_specs=pl.BlockSpec((tm_eff, tn_eff), lambda i, j: (i, j)),
            scratch_shapes=[pltpu.VMEM((tm_eff, Dp), cdtype)],                 # cached GELU(h)
        ),
        compiler_params=pltpu.CompilerParams(
            # j carries the cached hidden scratch across iterations -> "arbitrary";
            # the token-tile axis i is independent -> "parallel" (megacore).
            dimension_semantics=("parallel", "arbitrary"),
            vmem_limit_bytes=vmem_limit,
        ),
        cost_estimate=cost,
    )(x2d, w1p, b1p, w2p, b2p)

    return out2d[:M, :llm_dim].reshape(B, N, llm_dim)


def init_mlp_projector_params(key, vision_dim, llm_dim, dtype=jnp.float32):
    """Deterministic init matching nn.Linear's default U(-1/sqrt(fan_in), 1/sqrt(fan_in))."""
    k1, k2, k3, k4 = jax.random.split(key, 4)
    lim1 = 1.0 / math.sqrt(vision_dim)
    lim2 = 1.0 / math.sqrt(llm_dim)
    # Stored as (in_features, out_features) so the kernel does x @ W (equivalent
    # to PyTorch's x @ weight.T with weight of shape (out, in)).
    w1 = jax.random.uniform(k1, (vision_dim, llm_dim), dtype, -lim1, lim1)
    b1 = jax.random.uniform(k2, (llm_dim,), dtype, -lim1, lim1)
    w2 = jax.random.uniform(k3, (llm_dim, llm_dim), dtype, -lim2, lim2)
    b2 = jax.random.uniform(k4, (llm_dim,), dtype, -lim2, lim2)
    return w1, b1, w2, b2


if __name__ == "__main__":
    B, N = 2, 8            # batch, num image patches
    vision_dim, llm_dim = 32, 64

    key = jax.random.PRNGKey(0)
    kx, kp = jax.random.split(key)
    img_patches = jax.random.normal(kx, (B, N, vision_dim), jnp.float32)
    w1, b1, w2, b2 = init_mlp_projector_params(kp, vision_dim, llm_dim)

    # Pure-JAX reference (exact erf GELU, matching torch.nn.GELU()).
    h_ref = img_patches @ w1 + b1
    h_ref = 0.5 * h_ref * (1.0 + jax.lax.erf(h_ref / math.sqrt(2.0)))
    ref = h_ref @ w2 + b2

    # f32 path: bit-level parity with the reference.
    out = jax.block_until_ready(mlp_projector(img_patches, w1, b1, w2, b2))
    assert out.shape == (B, N, llm_dim)
    assert jnp.allclose(out, ref, atol=1e-5, rtol=1e-5), float(
        jnp.max(jnp.abs(out - ref)))

    # bf16 compute path (what real checkpoints use): loose tolerance vs f32 ref.
    out_bf16 = jax.block_until_ready(
        mlp_projector(img_patches, w1, b1, w2, b2, compute_dtype=jnp.bfloat16))
    assert jnp.allclose(out_bf16, ref, atol=1e-1, rtol=1e-1), float(
        jnp.max(jnp.abs(out_bf16 - ref)))

    print("KERNEL_OK")
</pallas_src>

<mosaic_0001>
module attributes {stable_mosaic.version = 11 : i64} {
  func.func @_mlp_projector_kernel(%arg0: i32, %arg1: i32, %arg2: memref<16x128xf32, #tpu.memory_space<vmem>>, %arg3: memref<128x128xf32, #tpu.memory_space<vmem>>, %arg4: memref<1x128xf32, #tpu.memory_space<vmem>>, %arg5: memref<128x128xf32, #tpu.memory_space<vmem>>, %arg6: memref<1x128xf32, #tpu.memory_space<vmem>>, %arg7: memref<16x128xf32, #tpu.memory_space<vmem>>, %arg8: memref<16x128xf32, #tpu.memory_space<vmem>>) attributes {dimension_semantics = [#tpu.dimension_semantics<parallel>, #tpu.dimension_semantics<arbitrary>], iteration_bounds = array<i64: 1, 1>, scalar_prefetch = 0 : i64, scratch_operands = 1 : i64, tpu.core_type = #tpu.core_type<tc>, window_params = [{transform_indices = @transform_0, window_bounds = array<i64: 16, 128>}, {pipeline_mode = #tpu.pipeline_mode<synchronous>, transform_indices = @transform_1, window_bounds = array<i64: 128, 128>}, {pipeline_mode = #tpu.pipeline_mode<synchronous>, transform_indices = @transform_2, window_bounds = array<i64: 1, 128>}, {transform_indices = @transform_3, window_bounds = array<i64: 128, 128>}, {transform_indices = @transform_4, window_bounds = array<i64: 1, 128>}, {transform_indices = @transform_5, window_bounds = array<i64: 16, 128>}]} {
    %c0_i32 = arith.constant 0 : i32
    %0 = arith.cmpi eq, %arg1, %c0_i32 : i32
    %1 = arith.extui %0 : i1 to i32
    %c0_i32_0 = arith.constant 0 : i32
    %2 = arith.cmpi ne, %1, %c0_i32_0 : i32
    scf.if %2 {
      %c0_8 = arith.constant 0 : index
      %c0_9 = arith.constant 0 : index
      %10 = vector.load %arg2[%c0_8, %c0_9] : memref<16x128xf32, #tpu.memory_space<vmem>>, vector<16x128xf32>
      %c0_10 = arith.constant 0 : index
      %c0_11 = arith.constant 0 : index
      %11 = vector.load %arg3[%c0_10, %c0_11] : memref<128x128xf32, #tpu.memory_space<vmem>>, vector<128x128xf32>
      %cst_12 = arith.constant dense<0.000000e+00> : vector<16x128xf32>
      %12 = tpu.matmul %10, %11, %cst_12 {dimension_numbers = #tpu.dot_dimension_numbers<[1], [0], [0], [1], [0, 0, 1, 1], [], []>} : vector<16x128xf32>, vector<128x128xf32>, vector<16x128xf32> -> vector<16x128xf32>
      %c0_13 = arith.constant 0 : index
      %c0_14 = arith.constant 0 : index
      %13 = vector.load %arg4[%c0_13, %c0_14] : memref<1x128xf32, #tpu.memory_space<vmem>>, vector<1x128xf32>
      %14 = vector.broadcast %13 : vector<1x128xf32> to vector<16x128xf32>
      %15 = arith.addf %12, %14 : vector<16x128xf32>
      %cst_15 = arith.constant 5.000000e-01 : f32
      %16 = vector.broadcast %cst_15 : f32 to vector<16x128xf32>
      %17 = arith.mulf %16, %15 : vector<16x128xf32>
      %cst_16 = arith.constant 0.707106769 : f32
      %18 = vector.broadcast %cst_16 : f32 to vector<16x128xf32>
      %19 = arith.mulf %15, %18 : vector<16x128xf32>
      %20 = math.erf %19 : vector<16x128xf32>
      %cst_17 = arith.constant 1.000000e+00 : f32
      %21 = vector.broadcast %cst_17 : f32 to vector<16x128xf32>
      %22 = arith.addf %21, %20 : vector<16x128xf32>
      %23 = arith.mulf %17, %22 : vector<16x128xf32>
      %c0_18 = arith.constant 0 : index
      %c0_19 = arith.constant 0 : index
      %24 = vector.load %arg8[%c0_18, %c0_19] : memref<16x128xf32, #tpu.memory_space<vmem>>, vector<16x128xf32>
      tpu.vector_store %arg8[%c0_18, %c0_19], %23 {strides = array<i32>} : memref<16x128xf32, #tpu.memory_space<vmem>>, vector<16x128xf32>,
    } else {
    }
    %c0 = arith.constant 0 : index
    %c0_1 = arith.constant 0 : index
    %3 = vector.load %arg8[%c0, %c0_1] : memref<16x128xf32, #tpu.memory_space<vmem>>, vector<16x128xf32>
    %c0_2 = arith.constant 0 : index
    %c0_3 = arith.constant 0 : index
    %4 = vector.load %arg5[%c0_2, %c0_3] : memref<128x128xf32, #tpu.memory_space<vmem>>, vector<128x128xf32>
    %cst = arith.constant dense<0.000000e+00> : vector<16x128xf32>
    %5 = tpu.matmul %3, %4, %cst {dimension_numbers = #tpu.dot_dimension_numbers<[1], [0], [0], [1], [0, 0, 1, 1], [], []>} : vector<16x128xf32>, vector<128x128xf32>, vector<16x128xf32> -> vector<16x128xf32>
    %c0_4 = arith.constant 0 : index
    %c0_5 = arith.constant 0 : index
    %6 = vector.load %arg6[%c0_4, %c0_5] : memref<1x128xf32, #tpu.memory_space<vmem>>, vector<1x128xf32>
    %7 = vector.broadcast %6 : vector<1x128xf32> to vector<16x128xf32>
    %8 = arith.addf %5, %7 : vector<16x128xf32>
    %c0_6 = arith.constant 0 : index
    %c0_7 = arith.constant 0 : index
    %9 = vector.load %arg7[%c0_6, %c0_7] : memref<16x128xf32, #tpu.memory_space<vmem>>, vector<16x128xf32>
    tpu.vector_store %arg7[%c0_6, %c0_7], %8 {strides = array<i32>} : memref<16x128xf32, #tpu.memory_space<vmem>>, vector<16x128xf32>,
    return
  }
  func.func @transform_0(%arg0: i32, %arg1: i32) -> (i32, i32) {
    %c0_i32 = arith.constant 0 : i32
    %c0_i32_0 = arith.constant 0 : i32
    return %arg0, %c0_i32 : i32, i32
  }
  func.func @transform_1(%arg0: i32, %arg1: i32) -> (i32, i32) {
    %c0_i32 = arith.constant 0 : i32
    %c0_i32_0 = arith.constant 0 : i32
    %c0_i32_1 = arith.constant 0 : i32
    return %c0_i32, %c0_i32_0 : i32, i32
  }
  func.func @transform_2(%arg0: i32, %arg1: i32) -> (i32, i32) {
    %c0_i32 = arith.constant 0 : i32
    %c0_i32_0 = arith.constant 0 : i32
    %c0_i32_1 = arith.constant 0 : i32
    return %c0_i32, %c0_i32_0 : i32, i32
  }
  func.func @transform_3(%arg0: i32, %arg1: i32) -> (i32, i32) {
    %c0_i32 = arith.constant 0 : i32
    %c0_i32_0 = arith.constant 0 : i32
    return %c0_i32, %arg1 : i32, i32
  }
  func.func @transform_4(%arg0: i32, %arg1: i32) -> (i32, i32) {
    %c0_i32 = arith.constant 0 : i32
    %c0_i32_0 = arith.constant 0 : i32
    return %c0_i32, %arg1 : i32, i32
  }
  func.func @transform_5(%arg0: i32, %arg1: i32) -> (i32, i32) {
    %c0_i32 = arith.constant 0 : i32
    return %arg0, %arg1 : i32, i32
  }
}

</mosaic_0001>

<bundles_post_ra>
// kernel: tpu_custom_call.1
= control target key start
LH: loop header
LB: loop body
LE: loop exit
PB: predicated region body
PF: predicated region fallthrough
CT: control target
= control target key end

     0   :  { %10 = vsyncpa [#allocation4], 0  ;;  %s568_s0 = inlined_call_operand.hbm [shape: f32[16,128], index: 0, kind: input, shape index: {}]   ;;  %s569_s1 = inlined_call_operand.hbm [shape: f32[128,128], index: 1, kind: input, shape index: {}]   ;;  %s570_s2 = inlined_call_operand.vmem [shape: f32[1,128], index: 2, kind: input, shape index: {}]   ;;  %s571_s3 = inlined_call_operand.hbm [shape: f32[128,128], index: 3, kind: input, shape index: {}]   ;;  %s572_s4 = inlined_call_operand.vmem [shape: f32[1,128], index: 4, kind: input, shape index: {}]   ;;  %s573_s5 = inlined_call_operand.hbm [shape: f32[16,128], index: 5, kind: output, shape index: {}]  }
   0x1   :  { %11 = vsyncpa [#allocation7], 0 }
   0x2   :  { %12 = vsyncpa [#allocation5], 0  ;;  %s502_s18 = smov [#allocation6]   ;;  %s503_s20 = smov [#allocation3]  }
   0x3   :  { %s30_s19 = sshll.u32 %s502_s18, 4  ;;  %s18_s21 = sshll.u32 %s503_s20, 4  ;;  %s31_s19 = int_to_ptr.vmem [resolvable:$true] %s30_s19  ;;  %s19_s21 = int_to_ptr.vmem [resolvable:$true] %s18_s21 }
   0x4   :  { %s424_s22 = scalar_lea.vmem %s31_s19, 2048  ;;  %p429_p1 = scmp.lt.s32.totalorder %s31_s19, %s31_s19 }
   0x5   :  { %p425_p0 = scmp.ne.s32.totalorder %s31_s19, %s424_s22  ;;  %p430_p2 = scmp.lt.s32.totalorder %s424_s22, %s424_s22 }
   0x7   :  { %p431_p3 = por %p430_p2, %p429_p1 }
   0x9   :  { %p432_p4 = pnand %p431_p3, %p425_p0 }
   0xb   :  { %435 = shalt.err (!%p432_p4)
}
   0xc   :  { %s504_s23 = smov 128   ;;  %s505_s24 = smov 8  }
   0xd   :  { %36 = dma.hbm_to_vmem [thread:$0]  %s569_s1, 2048, %s31_s19, [#allocation7], %s504_s23, %s504_s23, %s505_s24  }
   0xe   :  { %s444_s27 = scalar_lea.vmem %s19_s21, 256  ;;  %p449_p6 = scmp.lt.s32.totalorder %s19_s21, %s19_s21 }
   0xf   :  { %p445_p5 = scmp.ne.s32.totalorder %s19_s21, %s444_s27  ;;  %p450_p7 = scmp.lt.s32.totalorder %s444_s27, %s444_s27 }
  0x11   :  { %p451_p8 = por %p450_p7, %p449_p6 }
  0x13   :  { %p452_p9 = pnand %p451_p8, %p445_p5 }
  0x15   :  { %455 = shalt.err (!%p452_p9)
}
  0x16   :  { %24 = dma.hbm_to_vmem [thread:$0]  %s568_s0, 256, %s19_s21, [#allocation4], %s504_s23, %s504_s23, %s505_s24  }
  0x17   :  { %s506_s30 = smov [#allocation8]  }
  0x18   :  { %s44_s6 = sshll.u32 %s506_s30, 4  ;;  %s45_s6 = int_to_ptr.vmem [resolvable:$true] %s44_s6 }
  0x19   :  { %s464_s7 = scalar_lea.vmem %s45_s6, 2048  ;;  %p469_p11 = scmp.lt.s32.totalorder %s45_s6, %s45_s6 }
  0x1a   :  { %p465_p10 = scmp.ne.s32.totalorder %s45_s6, %s464_s7  ;;  %p470_p12 = scmp.lt.s32.totalorder %s464_s7, %s464_s7 }
  0x1c   :  { %p471_p13 = por %p470_p12, %p469_p11 }
  0x1e   :  { %p472_p0 = pnand %p471_p13, %p465_p10 }
  0x20   :  { %475 = shalt.err (!%p472_p0)
}
  0x21   :  { %50 = dma.hbm_to_vmem [thread:$0]  %s571_s3, 2048, %s45_s6, [#allocation7], %s504_s23, %s504_s23, %s505_s24  }
  0x22   :  { %496 = dma.done.wait [#allocation4], 256  }
  0x23   :  { %497 = vsyncadd [#allocation4], 4294967040 }
  0x24   :  { %498 = dma.done.wait [#allocation7], 4096  }
  0x25   :  { %499 = vsyncadd [#allocation7], 4294963200  ;;  %v83_v0 = vld [vmem:[#allocation6 + $0x78] sm:$0xff]  ;;  %v82_v1 = vld [vmem:[#allocation6 + $0x70] sm:$0xff]  ;;  %s507_s10 = smov [#allocation9]  }
  0x26   :  { %336 = vmatprep.subr.mxu0 %v83_v0  ;;  %v81_v2 = vld [vmem:[#allocation6 + $0x68] sm:$0xff]  ;;  %v80_v3 = vld [vmem:[#allocation6 + $0x60] sm:$0xff]  ;;  %v66_v4 = vld [vmem:[#allocation3] sm:$0xff]  ;;  %s285_s11 = sshll.u32 %s507_s10, 4  ;;  %s286_s11 = int_to_ptr.vmem [resolvable:$true] %s285_s11 }
  0x27   :  { %337 = vmatpush3.msra.mxu0 %v83_v0  ;;  %v79_v5 = vld [vmem:[#allocation6 + $0x58] sm:$0xff]  ;;  %368 = vmatprep.mubr.f32.mxu0 %v66_v4  ;;  %v194_v7 = vld [vmem:[#allocation8 + $0x70] sm:$0xff]  ;;  %v193_v9 = vld [vmem:[#allocation8 + $0x68] sm:$0xff]  ;;  %s476_s12 = scalar_lea.vmem %s286_s11, 256  ;;  %p481_p2 = scmp.lt.s32.totalorder %s286_s11, %s286_s11 }
  0x28   :  { %338 = vmatprep.subr.mxu0 %v82_v1  ;;  %v195_v6 = vld [vmem:[#allocation8 + $0x78] sm:$0xff]  ;;  %v78_v8 = vld [vmem:[#allocation6 + $0x50] sm:$0xff]  ;;  %v77_v10 = vld [vmem:[#allocation6 + $0x48] sm:$0xff]  ;;  %p477_p1 = scmp.ne.s32.totalorder %s286_s11, %s476_s12  ;;  %p482_p3 = scmp.lt.s32.totalorder %s476_s12, %s476_s12 }
  0x29   :  { %339 = vmatpush3.msra.mxu0 %v82_v1  ;;  %371 = vmatprep.subr.mxu1 %v195_v6  ;;  %v76_v11 = vld [vmem:[#allocation6 + $0x40] sm:$0xff]  ;;  %v75_v12 = vld [vmem:[#allocation6 + $0x38] sm:$0xff]  ;;  %v74_v13 = vld [vmem:[#allocation6 + $0x30] sm:$0xff] }
  0x2a   :  { %340 = vmatprep.subr.mxu0 %v81_v2  ;;  %372 = vmatpush3.msra.mxu1 %v195_v6  ;;  %v73_v14 = vld [vmem:[#allocation6 + $0x28] sm:$0xff]  ;;  %v72_v15 = vld [vmem:[#allocation6 + $0x20] sm:$0xff]  ;;  %v71_v16 = vld [vmem:[#allocation6 + $0x18] sm:$0xff]  ;;  %p483_p4 = por %p482_p3, %p481_p2 }
  0x2b   :  { %341 = vmatpush3.msra.mxu0 %v81_v2  ;;  %373 = vmatprep.subr.mxu1 %v194_v7  ;;  %v70_v17 = vld [vmem:[#allocation6 + $0x10] sm:$0xff]  ;;  %v69_v18 = vld [vmem:[#allocation6 + $0x8] sm:$0xff]  ;;  %v68_v19 = vld [vmem:[#allocation6] sm:$0xff] }
  0x2c   :  { %342 = vmatprep.subr.mxu0 %v80_v3  ;;  %374 = vmatpush3.msra.mxu1 %v194_v7  ;;  %v67_v20 = vld [vmem:[#allocation3 + $0x8] sm:$0xff]  ;;  %v192_v21 = vld [vmem:[#allocation8 + $0x60] sm:$0xff]  ;;  %v190_v23 = vld [vmem:[#allocation8 + $0x50] sm:$0xff]  ;;  %p484_p5 = pnand %p483_p4, %p477_p1 }
  0x2d   :  { %343 = vmatpush3.msra.mxu0 %v80_v3  ;;  %375 = vmatprep.subr.mxu1 %v193_v9  ;;  %v191_v22 = vld [vmem:[#allocation8 + $0x58] sm:$0xff]  ;;  %v189_v24 = vld [vmem:[#allocation8 + $0x48] sm:$0xff]  ;;  %v188_v25 = vld [vmem:[#allocation8 + $0x40] sm:$0xff] }
  0x2e   :  { %344 = vmatprep.subr.mxu0 %v79_v5  ;;  %376 = vmatpush3.msra.mxu1 %v193_v9  ;;  %v187_v26 = vld [vmem:[#allocation8 + $0x38] sm:$0xff]  ;;  %v186_v27 = vld [vmem:[#allocation8 + $0x30] sm:$0xff]  ;;  %v185_v28 = vld [vmem:[#allocation8 + $0x28] sm:$0xff] }
  0x2f   :  { %345 = vmatpush3.msra.mxu0 %v79_v5  ;;  %377 = vmatprep.subr.mxu1 %v192_v21  ;;  %v184_v29 = vld [vmem:[#allocation8 + $0x20] sm:$0xff]  ;;  %v183_v30 = vld [vmem:[#allocation8 + $0x18] sm:$0xff]  ;;  %v182_v31 = vld [vmem:[#allocation8 + $0x10] sm:$0xff] }
  0x30   :  { %346 = vmatprep.subr.mxu0 %v78_v8  ;;  %378 = vmatpush3.msra.mxu1 %v192_v21  ;;  %v181_v32 = vld [vmem:[#allocation8 + $0x8] sm:$0xff]  ;;  %v180_v33 = vld [vmem:[#allocation8] sm:$0xff]  ;;  %v298_v34 = vld [vmem:[%s570_s2] ss:$0 sm:$0xff] }
  0x31   :  { %347 = vmatpush3.msra.mxu0 %v78_v8  ;;  %379 = vmatprep.subr.mxu1 %v191_v22  ;;  %v299_v49 = vld [vmem:[%s572_s4] ss:$0 sm:$0xff] }
  0x32   :  { %348 = vmatprep.subr.mxu0 %v77_v10  ;;  %380 = vmatpush3.msra.mxu1 %v191_v22 }
  0x33   :  { %349 = vmatpush3.msra.mxu0 %v77_v10  ;;  %381 = vmatprep.subr.mxu1 %v190_v23 }
  0x34   :  { %350 = vmatprep.subr.mxu0 %v76_v11  ;;  %382 = vmatpush3.msra.mxu1 %v190_v23 }
  0x35   :  { %351 = vmatpush3.msra.mxu0 %v76_v11  ;;  %383 = vmatprep.subr.mxu1 %v189_v24 }
  0x36   :  { %352 = vmatprep.subr.mxu0 %v75_v12  ;;  %384 = vmatpush3.msra.mxu1 %v189_v24 }
  0x37   :  { %353 = vmatpush3.msra.mxu0 %v75_v12  ;;  %385 = vmatprep.subr.mxu1 %v188_v25 }
  0x38   :  { %354 = vmatprep.subr.mxu0 %v74_v13  ;;  %386 = vmatpush3.msra.mxu1 %v188_v25 }
  0x39   :  { %355 = vmatpush3.msra.mxu0 %v74_v13  ;;  %387 = vmatprep.subr.mxu1 %v187_v26 }
  0x3a   :  { %356 = vmatprep.subr.mxu0 %v73_v14  ;;  %388 = vmatpush3.msra.mxu1 %v187_v26 }
  0x3b   :  { %357 = vmatpush3.msra.mxu0 %v73_v14  ;;  %389 = vmatprep.subr.mxu1 %v186_v27 }
  0x3c   :  { %358 = vmatprep.subr.mxu0 %v72_v15  ;;  %390 = vmatpush3.msra.mxu1 %v186_v27 }
  0x3d   :  { %359 = vmatpush3.msra.mxu0 %v72_v15  ;;  %391 = vmatprep.subr.mxu1 %v185_v28 }
  0x3e   :  { %360 = vmatprep.subr.mxu0 %v71_v16  ;;  %392 = vmatpush3.msra.mxu1 %v185_v28 }
  0x3f   :  { %361 = vmatpush3.msra.mxu0 %v71_v16  ;;  %393 = vmatprep.subr.mxu1 %v184_v29 }
  0x40   :  { %362 = vmatprep.subr.mxu0 %v70_v17  ;;  %394 = vmatpush3.msra.mxu1 %v184_v29 }
  0x41   :  { %363 = vmatpush3.msra.mxu0 %v70_v17  ;;  %395 = vmatprep.subr.mxu1 %v183_v30 }
  0x42   :  { %364 = vmatprep.subr.mxu0 %v69_v18  ;;  %396 = vmatpush3.msra.mxu1 %v183_v30 }
  0x43   :  { %365 = vmatpush3.msra.mxu0 %v69_v18  ;;  %397 = vmatprep.subr.mxu1 %v182_v31 }
  0x44   :  { %366 = vmatprep.subr.mxu0 %v68_v19  ;;  %398 = vmatpush3.msra.mxu1 %v182_v31 }
  0x45   :  { %367 = vmatpush3.msra.mxu0 %v68_v19  ;;  %399 = vmatprep.subr.mxu1 %v181_v32 }
  0x46   :  { %369 = vmatmul.mubr.f32.vlgmr.msra.gmra.mxu0 %v67_v20  ;;  %400 = vmatpush3.msra.mxu1 %v181_v32 }
  0x47   :  { %401 = vmatprep.subr.mxu1 %v180_v33 }
  0x48   :  { %402 = vmatpush3.msra.mxu1 %v180_v33 }
 0x106   :  { %v370_v35 = vpop.f32.mrf.mxu0 }
 0x107   :  { %v163_v36 = vadd.f32 %v370_v35, %v298_v34 }
 0x108   :  { %v157_v37 = vpop.f32.mrf.mxu0 }
 0x109   :  { %v169_v38 = vmul.f32 0.70710677, %v163_v36  ;;  %v158_v39 = vadd.f32 %v298_v34, %v157_v37  ;;  %v167_v46 = vmul.f32 0.5, %v163_v36 }
 0x10b   :  { %412 = verf.f32 %v169_v38  ;;  %v168_v40 = vmul.f32 0.70710677, %v158_v39  ;;  %v166_v44 = vmul.f32 0.5, %v158_v39 }
 0x10d   :  { %414 = verf.f32 %v168_v40 }
 0x118   :  { %v413_v41 = vpop.eup %412 }
 0x119   :  { %v173_v43 = vadd.f32 1.0, %v413_v41 }
 0x11a   :  { %v415_v42 = vpop.eup %414 }
 0x11b   :  { %v172_v45 = vadd.f32 1.0, %v415_v42  ;;  %v175_v48 = vmul.f32 %v173_v43, %v167_v46 }
 0x11d   :  { %v174_v47 = vmul.f32 %v172_v45, %v166_v44 }
 0x11f   :  { %403 = vmatprep.mubr.f32.mxu1 %v174_v47 }
 0x120   :  { %404 = vmatmul.mubr.f32.vlgmr.msra.gmra.mxu1 %v175_v48 }
 0x1e0   :  { %v405_v50 = vpop.f32.mrf.mxu1 }
 0x1e1   :  { %v275_v51 = vadd.f32 %v405_v50, %v299_v49 }
 0x1e2   :  { %v269_v52 = vpop.f32.mrf.mxu1 }
 0x1e3   :  { %279 = vst [vmem:[#allocation9 + $0x8] sm:$0xff] %v275_v51  ;;  %v270_v53 = vadd.f32 %v299_v49, %v269_v52 }
 0x1e5   :  { %278 = vst [vmem:[#allocation9] sm:$0xff] %v270_v53 }
 0x1e6   :  { %487 = shalt.err (!%p484_p5)
}
 0x1e7   :  { %291 = dma.vmem_to_hbm [thread:$0]  %s286_s11, 256, %s573_s5, [#allocation5], %s504_s23, %s504_s23, %s505_s24  }
 0x1e8   :  { %500 = dma.done.wait [#allocation5], 256  }
 0x1e9   :  { %501 = vsyncadd [#allocation5], 4294967040 }
 0x1ea   :  { %295 = vsyncpa [#allocation4], 1 }
 0x1eb   :  { %296 = vsyncpa [#allocation7], 1 }
 0x1ec   :  { %297 = vsyncpa [#allocation5], 1 }

</bundles_post_ra>
